<compile_context>
chip_gen: v7x
topology: tpu7x:2x2x1
jax: 0.10.0
libtpu: 0.0.40
codegen_flags: <defaults>
</compile_context>

<pallas_src>
import functools

import jax
import jax.numpy as jnp
from jax import lax
from jax.experimental import pallas as pl
from jax.experimental.pallas import tpu as pltpu

BN_EPS = 1e-5  # PyTorch BatchNorm1d default eps


def _scaler_kernel(scale_ref, mu_ref, lv_ref, mu_out_ref, lv_out_ref, *, tau):
    # scale_ref: SMEM (1,) f32 learned scalar parameter.
    # mu_ref / lv_ref / outputs: VMEM [N, TILE_D] feature-column tiles.
    mu = mu_ref[...].astype(jnp.float32)
    lv = lv_ref[...].astype(jnp.float32)

    # ---- calculate_scale (purely scalar; no tile-sized broadcast materialized) ----
    s = scale_ref[0]
    sig = 1.0 / (1.0 + jnp.exp(-s))                 # sigmoid(scale)
    pos = jnp.sqrt(tau + (1.0 - tau) * sig)         # 'positive' mode
    neg = jnp.sqrt((1.0 - tau) * (1.0 - sig))       # 'negative': sigmoid(-s) = 1 - sigmoid(s)

    # ---- BatchNorm1d(affine=False), training-mode batch statistics ----
    # mean / biased variance over the batch axis (axis 0), per feature.
    mu_mean = jnp.mean(mu, axis=0, keepdims=True)
    mu_c = mu - mu_mean                             # centered tensor computed once, reused
    mu_var = jnp.mean(mu_c * mu_c, axis=0, keepdims=True)
    # fold the scalar scale into the [1, TILE_D] rsqrt row -> single full-tile multiply
    mu_out_ref[...] = (mu_c * (lax.rsqrt(mu_var + BN_EPS) * pos)).astype(mu_out_ref.dtype)

    lv_mean = jnp.mean(lv, axis=0, keepdims=True)
    lv_c = lv - lv_mean
    lv_var = jnp.mean(lv_c * lv_c, axis=0, keepdims=True)
    lv_out_ref[...] = (lv_c * (lax.rsqrt(lv_var + BN_EPS) * neg)).astype(lv_out_ref.dtype)


def _pick_tile_d(N, D, io_itemsize, budget_bytes=8 << 20):
    """Largest lane-aligned D-tile whose double-buffered I/O stays in budget."""
    if D % 128 != 0:
        # Non-lane-aligned D: block must span the full feature dim (single block).
        # TODO(synk): for D < 128 a transposed [D, N] lane-dense layout would avoid
        #             masked partial stores; not needed at the module's typical sizes.
        return D
    # 2 input + 2 output blocks, each double-buffered by the pipeline.
    per_col = 2 * 4 * N * io_itemsize
    t = (budget_bytes // per_col) // 128 * 128
    return int(max(128, min(D, t, 8192)))


def scaler_forward(mu, logvar, scale, tau=0.5, tile_d=None):
    """mu, logvar: [N, D]; scale: [1] learned scalar. Returns (mu', logvar')."""
    N, D = mu.shape
    assert logvar.shape == (N, D)

    io_itemsize = max(jnp.dtype(mu.dtype).itemsize, 4)  # BN math runs in f32 in-kernel
    if tile_d is None:
        tile_d = _pick_tile_d(N, D, io_itemsize)

    grid = (pl.cdiv(D, tile_d),)
    blk = pl.BlockSpec((N, tile_d), lambda j: (0, j))
    kernel = functools.partial(_scaler_kernel, tau=float(tau))

    return pl.pallas_call(
        kernel,
        grid=grid,
        in_specs=[
            pl.BlockSpec(memory_space=pltpu.SMEM),  # scale (scalar param, untiled)
            blk,                                    # mu    [N, TILE_D] column tile
            blk,                                    # logvar
        ],
        out_specs=(blk, blk),
        out_shape=(
            jax.ShapeDtypeStruct((N, D), mu.dtype),
            jax.ShapeDtypeStruct((N, D), logvar.dtype),
        ),
        compiler_params=pltpu.CompilerParams(
            # D-tiles are independent -> shard across v7x's two TensorCores.
            dimension_semantics=("parallel",),
            # Headroom for bigger tiles + f32 temporaries; 32 MiB is safe on
            # v5e (128 MiB phys), v6e (128 MiB phys) and v7x (64 MiB phys).
            vmem_limit_bytes=32 << 20,
        ),
    )(scale.astype(jnp.float32), mu, logvar)


def _reference(mu, logvar, scale, tau=0.5):
    """Pure-JAX reference mirroring the PyTorch forward (train-mode BN)."""
    def bn(x):
        m = jnp.mean(x, axis=0, keepdims=True)
        v = jnp.mean((x - m) ** 2, axis=0, keepdims=True)
        return (x - m) / jnp.sqrt(v + BN_EPS)

    sig = jax.nn.sigmoid(scale[0])
    mu_o = bn(mu) * jnp.sqrt(tau + (1 - tau) * sig)
    lv_o = bn(logvar) * jnp.sqrt((1 - tau) * jax.nn.sigmoid(-scale[0]))
    return mu_o, lv_o


if __name__ == "__main__":
    key = jax.random.PRNGKey(0)
    k_mu, k_lv, k_scale = jax.random.split(key, 3)

    tau = 0.5
    scale = jax.random.normal(k_scale, (1,), dtype=jnp.float32)  # ~ torch.randn(1)

    # Case 1: lane-aligned D -> tiled grid over the feature axis (2 tiles of 128).
    N, D = 16, 256
    mu = jax.random.normal(k_mu, (N, D), dtype=jnp.float32)
    logvar = jax.random.normal(k_lv, (N, D), dtype=jnp.float32)
    mu_out, lv_out = scaler_forward(mu, logvar, scale, tau=tau, tile_d=128)
    jax.block_until_ready((mu_out, lv_out))
    mu_ref, lv_ref = _reference(mu, logvar, scale, tau=tau)
    assert jnp.allclose(mu_out, mu_ref, atol=1e-5, rtol=1e-5)
    assert jnp.allclose(lv_out, lv_ref, atol=1e-5, rtol=1e-5)

    # Case 2: small feature dim (D=32, like the module's typical `dim`) -> single block.
    N2, D2 = 8, 32
    mu2 = jax.random.normal(k_mu, (N2, D2), dtype=jnp.float32)
    logvar2 = jax.random.normal(k_lv, (N2, D2), dtype=jnp.float32)
    mu2_out, lv2_out = scaler_forward(mu2, logvar2, scale, tau=tau)
    jax.block_until_ready((mu2_out, lv2_out))
    mu2_ref, lv2_ref = _reference(mu2, logvar2, scale, tau=tau)
    assert jnp.allclose(mu2_out, mu2_ref, atol=1e-5, rtol=1e-5)
    assert jnp.allclose(lv2_out, lv2_ref, atol=1e-5, rtol=1e-5)

    # Case 3: auto-picked tile on a larger, lane-aligned problem (exercises the
    #         tile picker + multi-step pipeline with 'parallel' grid axis).
    N3, D3 = 32, 1024
    mu3 = jax.random.normal(k_mu, (N3, D3), dtype=jnp.float32)
    logvar3 = jax.random.normal(k_lv, (N3, D3), dtype=jnp.float32)
    mu3_out, lv3_out = scaler_forward(mu3, logvar3, scale, tau=tau)
    jax.block_until_ready((mu3_out, lv3_out))
    mu3_ref, lv3_ref = _reference(mu3, logvar3, scale, tau=tau)
    assert jnp.allclose(mu3_out, mu3_ref, atol=1e-5, rtol=1e-5)
    assert jnp.allclose(lv3_out, lv3_ref, atol=1e-5, rtol=1e-5)

    print("KERNEL_OK")
</pallas_src>

<mosaic_0001>
module attributes {stable_mosaic.version = 11 : i64} {
  func.func @_scaler_kernel(%arg0: i32, %arg1: memref<1xf32, #tpu.memory_space<smem>>, %arg2: memref<16x128xf32, #tpu.memory_space<vmem>>, %arg3: memref<16x128xf32, #tpu.memory_space<vmem>>, %arg4: memref<16x128xf32, #tpu.memory_space<vmem>>, %arg5: memref<16x128xf32, #tpu.memory_space<vmem>>) attributes {dimension_semantics = [#tpu.dimension_semantics<parallel>], iteration_bounds = array<i64: 2>, scalar_prefetch = 0 : i64, scratch_operands = 0 : i64, tpu.core_type = #tpu.core_type<tc>, window_params = [{transform_indices = @transform_0, window_bounds = array<i64: 1>}, {transform_indices = @transform_1, window_bounds = array<i64: 16, 128>}, {transform_indices = @transform_2, window_bounds = array<i64: 16, 128>}, {transform_indices = @transform_3, window_bounds = array<i64: 16, 128>}, {transform_indices = @transform_4, window_bounds = array<i64: 16, 128>}]} {
    %c0 = arith.constant 0 : index
    %c0_0 = arith.constant 0 : index
    %0 = vector.load %arg2[%c0, %c0_0] : memref<16x128xf32, #tpu.memory_space<vmem>>, vector<16x128xf32>
    %c0_1 = arith.constant 0 : index
    %c0_2 = arith.constant 0 : index
    %1 = vector.load %arg3[%c0_1, %c0_2] : memref<16x128xf32, #tpu.memory_space<vmem>>, vector<16x128xf32>
    %c0_3 = arith.constant 0 : index
    %2 = memref.load %arg1[%c0_3] : memref<1xf32, #tpu.memory_space<smem>>
    %cst = arith.constant 0.000000e+00 : f32
    %3 = arith.subf %cst, %2 : f32
    %4 = math.exp %3 : f32
    %cst_4 = arith.constant 1.000000e+00 : f32
    %5 = arith.addf %cst_4, %4 : f32
    %cst_5 = arith.constant 1.000000e+00 : f32
    %6 = arith.divf %cst_5, %5 : f32
    %cst_6 = arith.constant 5.000000e-01 : f32
    %7 = arith.mulf %cst_6, %6 : f32
    %cst_7 = arith.constant 5.000000e-01 : f32
    %8 = arith.addf %cst_7, %7 : f32
    %9 = math.sqrt %8 : f32
    %cst_8 = arith.constant 1.000000e+00 : f32
    %10 = arith.subf %cst_8, %6 : f32
    %cst_9 = arith.constant 5.000000e-01 : f32
    %11 = arith.mulf %cst_9, %10 : f32
    %12 = math.sqrt %11 : f32
    %cst_10 = arith.constant dense<0.000000e+00> : vector<128xf32>
    %13 = vector.multi_reduction <add>, %0, %cst_10 [0] : vector<16x128xf32> to vector<128xf32>
    %14 = vector.shape_cast %13 : vector<128xf32> to vector<1x128xf32>
    %cst_11 = arith.constant 1.600000e+01 : f32
    %15 = vector.broadcast %cst_11 : f32 to vector<1x128xf32>
    %16 = arith.divf %14, %15 : vector<1x128xf32>
    %17 = vector.broadcast %16 : vector<1x128xf32> to vector<16x128xf32>
    %18 = arith.subf %0, %17 : vector<16x128xf32>
    %19 = arith.mulf %18, %18 : vector<16x128xf32>
    %cst_12 = arith.constant dense<0.000000e+00> : vector<128xf32>
    %20 = vector.multi_reduction <add>, %19, %cst_12 [0] : vector<16x128xf32> to vector<128xf32>
    %21 = vector.shape_cast %20 : vector<128xf32> to vector<1x128xf32>
    %cst_13 = arith.constant 1.600000e+01 : f32
    %22 = vector.broadcast %cst_13 : f32 to vector<1x128xf32>
    %23 = arith.divf %21, %22 : vector<1x128xf32>
    %cst_14 = arith.constant 9.99999974E-6 : f32
    %24 = vector.broadcast %cst_14 : f32 to vector<1x128xf32>
    %25 = arith.addf %23, %24 : vector<1x128xf32>
    %26 = math.rsqrt %25 : vector<1x128xf32>
    %27 = vector.broadcast %9 : f32 to vector<1x128xf32>
    %28 = arith.mulf %26, %27 : vector<1x128xf32>
    %29 = vector.broadcast %28 : vector<1x128xf32> to vector<16x128xf32>
    %30 = arith.mulf %18, %29 : vector<16x128xf32>
    %c0_15 = arith.constant 0 : index
    %c0_16 = arith.constant 0 : index
    %31 = vector.load %arg4[%c0_15, %c0_16] : memref<16x128xf32, #tpu.memory_space<vmem>>, vector<16x128xf32>
    tpu.vector_store %arg4[%c0_15, %c0_16], %30 {strides = array<i32>} : memref<16x128xf32, #tpu.memory_space<vmem>>, vector<16x128xf32>,
    %cst_17 = arith.constant dense<0.000000e+00> : vector<128xf32>
    %32 = vector.multi_reduction <add>, %1, %cst_17 [0] : vector<16x128xf32> to vector<128xf32>
    %33 = vector.shape_cast %32 : vector<128xf32> to vector<1x128xf32>
    %cst_18 = arith.constant 1.600000e+01 : f32
    %34 = vector.broadcast %cst_18 : f32 to vector<1x128xf32>
    %35 = arith.divf %33, %34 : vector<1x128xf32>
    %36 = vector.broadcast %35 : vector<1x128xf32> to vector<16x128xf32>
    %37 = arith.subf %1, %36 : vector<16x128xf32>
    %38 = arith.mulf %37, %37 : vector<16x128xf32>
    %cst_19 = arith.constant dense<0.000000e+00> : vector<128xf32>
    %39 = vector.multi_reduction <add>, %38, %cst_19 [0] : vector<16x128xf32> to vector<128xf32>
    %40 = vector.shape_cast %39 : vector<128xf32> to vector<1x128xf32>
    %cst_20 = arith.constant 1.600000e+01 : f32
    %41 = vector.broadcast %cst_20 : f32 to vector<1x128xf32>
    %42 = arith.divf %40, %41 : vector<1x128xf32>
    %cst_21 = arith.constant 9.99999974E-6 : f32
    %43 = vector.broadcast %cst_21 : f32 to vector<1x128xf32>
    %44 = arith.addf %42, %43 : vector<1x128xf32>
    %45 = math.rsqrt %44 : vector<1x128xf32>
    %46 = vector.broadcast %12 : f32 to vector<1x128xf32>
    %47 = arith.mulf %45, %46 : vector<1x128xf32>
    %48 = vector.broadcast %47 : vector<1x128xf32> to vector<16x128xf32>
    %49 = arith.mulf %37, %48 : vector<16x128xf32>
    %c0_22 = arith.constant 0 : index
    %c0_23 = arith.constant 0 : index
    %50 = vector.load %arg5[%c0_22, %c0_23] : memref<16x128xf32, #tpu.memory_space<vmem>>, vector<16x128xf32>
    tpu.vector_store %arg5[%c0_22, %c0_23], %49 {strides = array<i32>} : memref<16x128xf32, #tpu.memory_space<vmem>>, vector<16x128xf32>,
    return
  }
  func.func @transform_0(%arg0: i32) -> i32 {
    %c0_i32 = arith.constant 0 : i32
    %c0_i32_0 = arith.constant 0 : i32
    return %c0_i32 : i32
  }
  func.func @transform_1(%arg0: i32) -> (i32, i32) {
    %c0_i32 = arith.constant 0 : i32
    %c0_i32_0 = arith.constant 0 : i32
    return %c0_i32, %arg0 : i32, i32
  }
  func.func @transform_2(%arg0: i32) -> (i32, i32) {
    %c0_i32 = arith.constant 0 : i32
    %c0_i32_0 = arith.constant 0 : i32
    return %c0_i32, %arg0 : i32, i32
  }
  func.func @transform_3(%arg0: i32) -> (i32, i32) {
    %c0_i32 = arith.constant 0 : i32
    %c0_i32_0 = arith.constant 0 : i32
    return %c0_i32, %arg0 : i32, i32
  }
  func.func @transform_4(%arg0: i32) -> (i32, i32) {
    %c0_i32 = arith.constant 0 : i32
    %c0_i32_0 = arith.constant 0 : i32
    return %c0_i32, %arg0 : i32, i32
  }
}

</mosaic_0001>

<bundles_post_ra>
// kernel: tpu_custom_call.1
= control target key start
LH: loop header
LB: loop body
LE: loop exit
PB: predicated region body
PF: predicated region fallthrough
CT: control target
= control target key end

     0   :  { %s1090_s0 = inlined_call_operand.<no memory space> [shape: f32[1], index: 0, kind: input, shape index: {}]   ;;  %s1091_s1 = inlined_call_operand.hbm [shape: f32[16,256], index: 1, kind: input, shape index: {}]   ;;  %s1092_s2 = inlined_call_operand.hbm [shape: f32[16,256], index: 2, kind: input, shape index: {}]   ;;  %s1093_s3 = inlined_call_operand.hbm [shape: f32[16,256], index: 3, kind: output, shape index: {0}]   ;;  %s1094_s4 = inlined_call_operand.hbm [shape: f32[16,256], index: 4, kind: output, shape index: {1}]  }
   0x1   :  { %10 = sst [smem:[#allocation2]] %s1090_s0 }
   0x2   :  { %11 = vsyncpa [#allocation4], 0 }
   0x3   :  { %13 = vsyncpa [#allocation4 + $0x1], 0 }
   0x4   :  { %14 = vsyncpa [#allocation7], 0 }
   0x5   :  { %16 = vsyncpa [#allocation7 + $0x1], 0 }
   0x6   :  { %17 = vsyncpa [#allocation5], 0 }
   0x7   :  { %19 = vsyncpa [#allocation5 + $0x1], 0 }
   0x8   :  { %20 = vsyncpa [#allocation10], 0 }
   0x9   :  { %22 = vsyncpa [#allocation10 + $0x1], 0  ;;  %s822_s17 = smov 0   ;;  %s824_s18 = smov 0  }
   0xa   :  { %s826_s19 = smov 0   ;;  %s828_s20 = smov 0  }
   0xb LB: > { %s843_s0 = sadd.s32 4294967295, %s782_s20   ;;  %s520_s21 = sadd.s32 4294967294, %s782_s20   ;;  %s782_s20 = sphi %s828_s20, %s1111_s20   ;;  %s778_s19 = sphi %s826_s19, %s1110_s19   ;;  %s774_s18 = sphi %s824_s18, %s1109_s18   ;;  %s770_s17 = sphi %s822_s17, %s1108_s17  }
   0xc   : > { %s847_s22 = sadd.s32 1, %s782_s20   ;;  %s56_s23 = sadd.s32 1, %s778_s19 }
   0xd   : > { %s53_s24 = ssub.s32 %s782_s20, %s847_s22  ;;  %p63_p0 = scmp.ne.s32.totalorder %s778_s19, %s774_s18 }
   0xe   : > { %p54_p1 = scmp.eq.s32.totalorder %s53_s24, 0  ;;  %p64_p2 = scmp.eq.s32.totalorder %s782_s20, 0 }
   0xf   : > { %p69_p3 = scmp.ne.s32.totalorder %s774_s18, %s770_s17  ;;  %p70_p4 = scmp.eq.s32.totalorder %s843_s0, 0 }
  0x10   : > { %s859_s25 = scalar_select %p54_p1, %s778_s19, %s56_s23  }
  0x11   : > { %p861_p5 = por %p64_p2, %p63_p0  ;;  %p865_p6 = por %p70_p4, %p69_p3 }
  0x12   : > { %p119_p7 = scmp.eq.s32.totalorder %s843_s0, 1  ;;  %p125_p8 = scmp.eq.s32.totalorder %s520_s21, 1 }
  0x13   : > { %s1098_s27 = scalar_select %p865_p6, 1, 0 }
  0x14   : > { %p568_p10 = scmp.lt.s32.totalorder %s782_s20, 2  ;;  %p872_p11 = por %p119_p7, %p63_p0 }
  0x15   : > { %p876_p12 = por %p125_p8, %p69_p3  ;;  %s881_s30 = sand.u32 1, %s778_s19  }
  0x16   : > { %s1099_s28 = scalar_select %p872_p11, 1, 0 }
  0x17   : > { %s1100_s29 = scalar_select %p876_p12, 1, 0 }
  0x18   : > { %s524_s5 = sshll.u32 %s782_s20, 7  ;;  %s523_s6 = sshll.u32 %s881_s30, 4 }
  0x19   : > { %s890_s9 = scalar_lea.hbm %s1091_s1, %s524_s5  ;;  %s178_s10 = scalar_lea.vmem [#allocation3], %s523_s6 }
  0x1a   : > { %s184_s11 = sshll.u32 %s178_s10, 4  ;;  %p896_p13 = pnand %p568_p10, %p861_p5  ;;  %s900_s11 = int_to_ptr.vmem [resolvable:$true] %s184_s11 }
  0x1b   : > { %s175_s13 = scalar_lea.sflag [#allocation4], %s881_s30  ;;  %s620_s14 = scalar_lea.hbm %s890_s9, 256 }
  0x1c   : > { %p621_p1 = scmp.ne.s32.totalorder %s890_s9, %s620_s14  ;;  %p622_p2 = pneg %p896_p13 }
  0x1d   : > { %s625_s21 = scalar_lea.hbm %s1091_s1, 512  ;;  %p626_p5 = scmp.lt.u32.totalorder %s890_s9, %s1091_s1 }
  0x1e   : > { %p623_p3 = pnand %p622_p2, %p621_p1  ;;  %p627_p7 = scmp.lt.u32.totalorder %s625_s21, %s620_s14 }
  0x1f   : > { %p629_p10 = scmp.lt.u32.totalorder %s620_s14, %s890_s9 }
  0x20   : > { %p624_p4 = pneg %p623_p3  ;;  %p628_p8 = por %p627_p7, %p626_p5 }
  0x22   : > { %p630_p9 = por %p629_p10, %p628_p8 }
  0x24   : > { %p631_p0 = pnand %p630_p9, %p624_p4 }
  0x26   : > { %634 = shalt.err (!%p631_p0)
}
  0x27   : > { %s635_s26 = scalar_lea.vmem %s900_s11, 256  ;;  %s784_s7 = smov [#allocation3]  }
  0x28   : > { %p636_p1 = scmp.ne.s32.totalorder %s900_s11, %s635_s26  ;;  %s640_s8 = sshll.u32 %s784_s7, 4  ;;  %s641_s8 = int_to_ptr.vmem [resolvable:$false] %s640_s8 }
  0x29   : > { %s642_s10 = scalar_lea.vmem %s641_s8, 512  ;;  %p643_p11 = scmp.lt.s32.totalorder %s900_s11, %s641_s8 }
  0x2a   : > { %p638_p3 = pnand %p636_p1, %p622_p2  ;;  %p644_p5 = scmp.lt.s32.totalorder %s642_s10, %s635_s26 }
  0x2c   : > { %p639_p12 = pneg %p638_p3  ;;  %p645_p7 = por %p644_p5, %p643_p11 }
  0x2e   : > { %p646_p8 = pnand %p645_p7, %p639_p12 }
  0x30   : > { %649 = shalt.err (!%p646_p8)
}
  0x31   : > { %s785_s14 = smov 256   ;;  %s786_s15 = smov 128  }
  0x32   : > { %s787_s16 = smov 8   ;;  %p212_p9 = scmp.lt.s32.totalorder %s782_s20, 3 }
  0x33   : > { %557 = dma.hbm_to_vmem [thread:$0]  (!%p896_p13), %s890_s9, 256, %s900_s11, %s175_s13, %s785_s14, %s786_s15, %s787_s16  }
  0x34   : > { %s940_s24 = scalar_lea.hbm %s1092_s2, %s524_s5  ;;  %p1102_p11 = scmp.ge.s32.totalorder %s782_s20, 1 }
  0x35   : > { %s198_s7 = scalar_lea.vmem [#allocation6], %s523_s6  ;;  %s195_s9 = scalar_lea.sflag [#allocation7], %s881_s30 }
  0x36   : > { %p944_p12 = pnand %p1102_p11, %p212_p9  ;;  %s204_s8 = sshll.u32 %s198_s7, 4  ;;  %s950_s8 = int_to_ptr.vmem [resolvable:$true] %s204_s8 }
  0x37   : > { %s650_s11 = scalar_lea.hbm %s940_s24, 256  ;;  %s655_s10 = scalar_lea.hbm %s1092_s2, 512 }
  0x38   : > { %p651_p0 = scmp.ne.s32.totalorder %s940_s24, %s650_s11  ;;  %p656_p1 = scmp.lt.u32.totalorder %s940_s24, %s1092_s2 }
  0x39   : > { %p657_p3 = scmp.lt.u32.totalorder %s655_s10, %s650_s11  ;;  %p659_p7 = scmp.lt.u32.totalorder %s650_s11, %s940_s24 }
  0x3a   : > { %p653_p4 = pnand %p651_p0, %p622_p2 }
  0x3b   : > { %p658_p5 = por %p657_p3, %p656_p1 }
  0x3c   : > { %p654_p10 = pneg %p653_p4 }
  0x3d   : > { %p660_p8 = por %p659_p7, %p658_p5 }
  0x3f   : > { %p661_p9 = pnand %p660_p8, %p654_p10 }
  0x41   : > { %664 = shalt.err (!%p661_p9)
}
  0x42   : > { %s665_s6 = scalar_lea.vmem %s950_s8, 256  ;;  %s788_s7 = smov [#allocation6]  }
  0x43   : > { %p666_p11 = scmp.ne.s32.totalorder %s950_s8, %s665_s6  ;;  %s670_s5 = sshll.u32 %s788_s7, 4  ;;  %s671_s5 = int_to_ptr.vmem [resolvable:$false] %s670_s5 }
  0x44   : > { %s672_s13 = scalar_lea.vmem %s671_s5, 512  ;;  %p673_p6 = scmp.lt.s32.totalorder %s950_s8, %s671_s5 }
  0x45   : > { %p668_p0 = pnand %p666_p11, %p622_p2  ;;  %p674_p1 = scmp.lt.s32.totalorder %s672_s13, %s665_s6 }
  0x47   : > { %p669_p4 = pneg %p668_p0  ;;  %p675_p3 = por %p674_p1, %p673_p6 }
  0x49   : > { %p676_p5 = pnand %p675_p3, %p669_p4 }
  0x4b   : > { %679 = shalt.err (!%p676_p5)
}
  0x4c   : > { %560 = dma.hbm_to_vmem [thread:$0]  (!%p896_p13), %s940_s24, 256, %s950_s8, %s195_s9, %s785_s14, %s786_s15, %s787_s16  }
  0x4d   : > { %216 = sbr.rel (%p944_p12) target bundleno = 337 (0x151), region = 32  ;;  %s984_s11 = sand.u32 (!%p944_p12), 1, %s774_s18  }
  0x4e   : > { %s987_s10 = sshll.u32 (!%p944_p12), %s984_s11, 4  ;;  %s219_s12 = scalar_lea.sflag (!%p944_p12), [#allocation4], %s984_s11 }
  0x4f   : > { %s222_s21 = scalar_lea.vmem (!%p944_p12), [#allocation3], %s987_s10  ;;  %p1104_p6 = scmp.ne.s32.totalorder (!%p944_p12), %s1098_s27, 0 }
  0x54   : > { %753 = dma.done.wait (%p1104_p6), %s219_s12, 256  }
  0x55   : > { %755 = vsyncadd (%p1104_p6), %s219_s12, 4294967040  ;;  %s228_s30 = scalar_lea.sflag [#allocation7], %s984_s11  ;;  %s231_s14 = scalar_lea.vmem [#allocation6], %s987_s10 }
  0x56   : > { %757 = dma.done.wait (%p1104_p6), %s228_s30, 256  }
  0x57   : > { %759 = vsyncadd (%p1104_p6), %s228_s30, 4294967040  ;;  %s270_s15 = sld [smem:[#allocation2]]  ;;  %v266_v5 = vld [vmem:[%s222_s21] sm:$0xff]  ;;  %v267_v6 = vld [vmem:[%s222_s21 + $0x8] sm:$0xff]  ;;  %s258_s7 = scalar_lea.vmem [#allocation8], %s987_s10 }
  0x58   : > { %v268_v7 = vld [vmem:[%s231_s14] sm:$0xff]  ;;  %v269_v8 = vld [vmem:[%s231_s14 + $0x8] sm:$0xff]  ;;  %v302_v9 = vadd.f32 %v267_v6, %v266_v5  ;;  %s377_s5 = sshll.u32 %s258_s7, 4  ;;  %s265_s13 = scalar_lea.vmem [#allocation9], %s987_s10  ;;  %s1004_s5 = int_to_ptr.vmem [resolvable:$true] %s377_s5 }
  0x59   : > { %v331_v10 = vadd.f32 %v269_v8, %v268_v7  ;;  %s392_s12 = sshll.u32 %s265_s13, 4  ;;  %s534_s30 = sshll.u32 %s843_s0, 7  ;;  %s1006_s12 = int_to_ptr.vmem [resolvable:$true] %s392_s12 }
  0x5a   : > { %v303_v11 = vrot.slane %v302_v9, 4  ;;  %s1011_s10 = scalar_lea.hbm %s1093_s3, %s534_s30  ;;  %p1105_p2 = scmp.ne.s32.totalorder %s1099_s28, 0 }
  0x5b   : > { %v332_v12 = vrot.slane %v331_v10, 4 }
  0x5c   : > { %v304_v13 = vadd.f32 %v303_v11, %v302_v9 }
  0x5d   : > { %s271_s16 = ssub.f32 0.0, %s270_s15  ;;  %v333_v14 = vadd.f32 %v332_v12, %v331_v10 }
  0x5e   : > { %v305_v15 = vrot.slane %v304_v13, 2 }
  0x5f   : > { %v272_v0 = vstv %s271_s16  ;;  %v334_v16 = vrot.slane %v333_v14, 2 }
  0x60   : > { %v273_v1 = vmul.f32 1.442695, %v272_v0  ;;  %v306_v17 = vadd.f32 %v305_v15, %v304_v13 }
  0x61   : > { %v335_v18 = vadd.f32 %v334_v16, %v333_v14 }
  0x62   : > { %608 = vpow2.f32 %v273_v1  ;;  %v307_v19 = vrot.slane %v306_v17, 1 }
  0x63   : > { %v336_v20 = vrot.slane %v335_v18, 1 }
  0x64   : > { %v308_v23 = vadd.f32 %v307_v19, %v306_v17 }
  0x65   : > { %v337_v24 = vadd.f32 %v336_v20, %v335_v18 }
  0x66   : > { %v310_v25 = vmul.f32 0.0625, %v308_v23 }
  0x67   : > { %v338_v26 = vmul.f32 0.0625, %v337_v24 }
  0x68   : > { %v311_v27 = vsub.f32 %v266_v5, %v310_v25  ;;  %v312_v28 = vsub.f32 %v267_v6, %v310_v25 }
  0x69   : > { %v339_v29 = vsub.f32 %v268_v7, %v338_v26  ;;  %v340_v31 = vsub.f32 %v269_v8, %v338_v26 }
  0x6a   : > { %v313_v34 = vmul.f32 %v311_v27, %v311_v27  ;;  %v314_v35 = vmul.f32 %v312_v28, %v312_v28 }
  0x6b   : > { %v341_v38 = vmul.f32 %v339_v29, %v339_v29  ;;  %v342_v43 = vmul.f32 %v340_v31, %v340_v31 }
  0x6c   : > { %v609_v2 = vpop.eup %608  ;;  %v315_v45 = vadd.f32 %v314_v35, %v313_v34 }
  0x6d   : > { %538 = vpush %v609_v2  ;;  %v343_v46 = vadd.f32 %v342_v43, %v341_v38 }
  0x6e   : > { %v316_v47 = vrot.slane %v315_v45, 4 }
  0x6f   : > { %v344_v48 = vrot.slane %v343_v46, 4 }
  0x70   : > { %v317_v49 = vadd.f32 %v316_v47, %v315_v45 }
  0x71   : > { %v345_v50 = vadd.f32 %v344_v48, %v343_v46 }
  0x72   : > { %v318_v51 = vrot.slane %v317_v49, 2 }
  0x73   : > { %v346_v52 = vrot.slane %v345_v50, 2 }
  0x74   : > { %v319_v53 = vadd.f32 %v318_v51, %v317_v49 }
  0x75   : > { %v347_v54 = vadd.f32 %v346_v52, %v345_v50 }
  0x76   : > { %v320_v55 = vrot.slane %v319_v53, 1 }
  0x77   : > { %v348_v56 = vrot.slane %v347_v54, 1 }
  0x78   : > { %v321_v57 = vadd.f32 %v320_v55, %v319_v53 }
  0x79   : > { %v349_v58 = vadd.f32 %v348_v56, %v347_v54 }
  0x7a   : > { %v322_v59 = vmul.f32 0.0625, %v321_v57 }
  0x7b   : > { %v350_v60 = vmul.f32 0.0625, %v349_v58 }
  0x7c   : > { %v323_v61 = vadd.f32 1e-05, %v322_v59 }
  0x7d   : > { %v351_v62 = vadd.f32 1e-05, %v350_v60 }
  0x9e   : > { %s539_s24 = spop %538 }
  0x9f   : > { %s276_s26 = sadd.f32 1.0, %s539_s24 }
  0xa1   : > { %v277_v3 = vstv %s276_s26  ;;  %s1016_s26 = scalar_lea.hbm %s1094_s4, %s534_s30 }
  0xa2   : > { %610 = vrcp.f32 %v277_v3 }
  0xac   : > { %v611_v4 = vpop.eup %610 }
  0xad   : > { %540 = vpush %v611_v4 }
  0xde   : > { %s541_s27 = spop %540 }
  0xdf   : > { %s280_s8 = smul.f32 0.5, %s541_s27  ;;  %s291_s9 = ssub.f32 1.0, %s541_s27 }
  0xe0   : > { %s360_s27 = scalar_lea.sflag [#allocation5], %s984_s11 }
  0xe1   : > { %s281_s23 = sadd.f32 0.5, %s280_s8  ;;  %s292_s6 = smul.f32 0.5, %s291_s9 }
  0xe2   : > { %s680_s8 = scalar_lea.vmem %s1004_s5, 256  ;;  %s789_s9 = smov [#allocation8]  }
  0xe3   : > { %v282_v21 = vstv %s281_s23  ;;  %v293_v22 = vstv %s292_s6  ;;  %p681_p13 = scmp.ne.s32.totalorder %s1004_s5, %s680_s8  ;;  %s684_s23 = sshll.u32 %s789_s9, 4  ;;  %s685_s23 = int_to_ptr.vmem [resolvable:$false] %s684_s23 }
  0xe4   : > { %612 = vrsqrt.f32 %v282_v21  ;;  %vm285_vm0 = vcmp.eq.f32.partialorder %v282_v21, inf  ;;  %v288_v36 = vand.u32 2147483648, %v282_v21  ;;  %vm287_vm1 = vcmp.eq.f32.partialorder %v282_v21, 0.0  ;;  %s686_s6 = scalar_lea.vmem %s685_s23, 512  ;;  %p687_p7 = scmp.lt.s32.totalorder %s1004_s5, %s685_s23 }
  0xe5   : > { %614 = vrsqrt.f32 %v293_v22  ;;  %vm296_vm2 = vcmp.eq.f32.partialorder %v293_v22, inf  ;;  %v299_v40 = vand.u32 2147483648, %v293_v22  ;;  %vm298_vm3 = vcmp.eq.f32.partialorder %v293_v22, 0.0  ;;  %p682_p12 = pnand %p681_p13, %p1105_p2  ;;  %p688_p8 = scmp.lt.s32.totalorder %s686_s6, %s680_s8 }
  0xe6   : > { %616 = vrsqrt.f32 %v323_v61 }
  0xe7   : > { %618 = vrsqrt.f32 %v351_v62  ;;  %p683_p10 = pneg %p682_p12  ;;  %p689_p9 = por %p688_p8, %p687_p7 }
  0xe9   : > { %p690_p11 = pnand %p689_p9, %p683_p10 }
  0xee   : > { %v613_v30 = vpop.eup %612 }
  0xef   : > { %v615_v32 = vpop.eup %614  ;;  %v284_v33 = vmul.f32 %v613_v30, %v282_v21 }
  0xf0   : > { %v295_v37 = vmul.f32 %v615_v32, %v293_v22  ;;  %v617_v63 = vpop.eup %616 }
  0xf1   : > { %v286_v39 = vsel %vm285_vm0, %v282_v21, %v284_v33  ;;  %v619_v0 = vpop.eup %618 }
  0xf2   : > { %v289_v41 = vsel %vm287_vm1, %v288_v36, %v286_v39  ;;  %v297_v42 = vsel %vm296_vm2, %v293_v22, %v295_v37 }
  0xf3   : > { %542 = vpush %v289_v41  ;;  %v300_v44 = vsel %vm298_vm3, %v299_v40, %v297_v42 }
  0xf4   : > { %544 = vpush %v300_v44 }
 0x124   : > { %s543_s21 = spop %542 }
 0x125   : > { %v325_v1 = vstv %s543_s21  ;;  %s545_s14 = spop %544 }
 0x126   : > { %v326_v2 = vmul.f32 %v617_v63, %v325_v1  ;;  %v353_v3 = vstv %s545_s14 }
 0x127   : > { %v354_v4 = vmul.f32 %v619_v0, %v353_v3 }
 0x128   : > { %v327_v5 = vmul.f32 %v326_v2, %v311_v27  ;;  %v328_v6 = vmul.f32 %v326_v2, %v312_v28 }
 0x129   : > { %v355_v7 = vmul.f32 %v354_v4, %v339_v29  ;;  %v356_v8 = vmul.f32 %v354_v4, %v340_v31 }
 0x12a   : > { %329 = vst [vmem:[%s258_s7] sm:$0xff] %v327_v5  ;;  %330 = vst [vmem:[%s258_s7 + $0x8] sm:$0xff] %v328_v6 }
 0x12b   : > { %357 = vst [vmem:[%s265_s13] sm:$0xff] %v355_v7  ;;  %358 = vst [vmem:[%s265_s13 + $0x8] sm:$0xff] %v356_v8 }
 0x12c   : > { %693 = shalt.err (!%p690_p11)
}
 0x12d   : > { %s694_s7 = scalar_lea.hbm %s1011_s10, 256  ;;  %s698_s30 = scalar_lea.hbm %s1093_s3, 512 }
 0x12e   : > { %p695_p0 = scmp.ne.s32.totalorder %s1011_s10, %s694_s7  ;;  %p699_p3 = scmp.lt.u32.totalorder %s1011_s10, %s1093_s3 }
 0x12f   : > { %p700_p5 = scmp.lt.u32.totalorder %s698_s30, %s694_s7  ;;  %p702_p13 = scmp.lt.u32.totalorder %s694_s7, %s1011_s10 }
 0x130   : > { %p696_p4 = pnand %p695_p0, %p1105_p2 }
 0x131   : > { %p701_p6 = por %p700_p5, %p699_p3 }
 0x132   : > { %p697_p1 = pneg %p696_p4 }
 0x133   : > { %p703_p12 = por %p702_p13, %p701_p6 }
 0x135   : > { %p704_p10 = pnand %p703_p12, %p697_p1 }
 0x137   : > { %707 = shalt.err (!%p704_p10)
}
 0x138   : > { %s790_s16 = smov 128   ;;  %s791_s0 = smov 256  }
 0x139   : > { %s792_s24 = smov 8   ;;  %s365_s8 = scalar_lea.sflag [#allocation10], %s984_s11 }
 0x13a   : > { %550 = dma.vmem_to_hbm [thread:$0]  (%p1105_p2), %s1004_s5, 256, %s1011_s10, %s360_s27, %s790_s16, %s791_s0, %s792_s24  }
 0x13b   : > { %s708_s9 = scalar_lea.vmem %s1006_s12, 256  ;;  %s793_s23 = smov [#allocation9]  }
 0x13c   : > { %p709_p7 = scmp.ne.s32.totalorder %s1006_s12, %s708_s9  ;;  %s712_s6 = sshll.u32 %s793_s23, 4  ;;  %s713_s6 = int_to_ptr.vmem [resolvable:$false] %s712_s6 }
 0x13d   : > { %s714_s7 = scalar_lea.vmem %s713_s6, 512  ;;  %p715_p11 = scmp.lt.s32.totalorder %s1006_s12, %s713_s6 }
 0x13e   : > { %p710_p8 = pnand %p709_p7, %p1105_p2  ;;  %p716_p0 = scmp.lt.s32.totalorder %s714_s7, %s708_s9 }
 0x140   : > { %p711_p9 = pneg %p710_p8  ;;  %p717_p4 = por %p716_p0, %p715_p11 }
 0x142   : > { %p718_p1 = pnand %p717_p4, %p711_p9 }
 0x144   : > { %721 = shalt.err (!%p718_p1)
}
 0x145   : > { %s722_s5 = scalar_lea.hbm %s1016_s26, 256  ;;  %s726_s13 = scalar_lea.hbm %s1094_s4, 512 }
 0x146   : > { %p723_p3 = scmp.ne.s32.totalorder %s1016_s26, %s722_s5  ;;  %p727_p13 = scmp.lt.u32.totalorder %s1016_s26, %s1094_s4 }
 0x147   : > { %p728_p12 = scmp.lt.u32.totalorder %s726_s13, %s722_s5  ;;  %p730_p7 = scmp.lt.u32.totalorder %s722_s5, %s1016_s26 }
 0x148   : > { %p724_p5 = pnand %p723_p3, %p1105_p2 }
 0x149   : > { %p729_p10 = por %p728_p12, %p727_p13 }
 0x14a   : > { %p725_p6 = pneg %p724_p5 }
 0x14b   : > { %p731_p8 = por %p730_p7, %p729_p10 }
 0x14d   : > { %p732_p9 = pnand %p731_p8, %p725_p6 }
 0x14f   : > { %735 = shalt.err (!%p732_p9)
}
 0x150   : > { %551 = dma.vmem_to_hbm [thread:$0]  (%p1105_p2), %s1006_s12, 256, %s1016_s26, %s365_s8, %s790_s16, %s791_s0, %s792_s24  }
 0x151 PF: > { %s407_s14 = sand.u32 1, %s770_s17   ;;  %p1106_p11 = scmp.ne.s32.totalorder %s1100_s29, 0 }
 0x152   : > { %p1107_p0 = scmp.ge.s32.totalorder %s782_s20, 2  ;;  %s408_s15 = scalar_lea.sflag [#allocation5], %s407_s14 }
 0x154   : > { %p562_p4 = pnand %p1107_p0, %p1106_p11 }
 0x156   : > { %761 = dma.done.wait (!%p562_p4), %s408_s15, 256  }
 0x157   : > { %763 = vsyncadd (!%p562_p4), %s408_s15, 4294967040  ;;  %s417_s28 = scalar_lea.sflag [#allocation10], %s407_s14 }
 0x158   : > { %765 = dma.done.wait (!%p562_p4), %s417_s28, 256  }
 0x159   : > { %767 = vsyncadd (!%p562_p4), %s417_s28, 4294967040  ;;  %p25_p2 = scmp.ge.s32.totalorder %s847_s22, 4   ;;  %s1108_s17 = smov %s774_s18 }
 0x15a   : > { %s1109_s18 = smov %s778_s19  ;;  %s1110_s19 = smov %s859_s25 }
 0x15b   : > { %s1111_s20 = smov %s847_s22  ;;  %27 = sbr.rel (!%p25_p2) target bundleno = 11 (0xb), region = 107 }
 0x162   :  { %422 = vsyncpa [#allocation4], 1 }
 0x163   :  { %424 = vsyncpa [#allocation4 + $0x1], 1 }
 0x164   :  { %425 = vsyncpa [#allocation7], 1 }
 0x165   :  { %427 = vsyncpa [#allocation7 + $0x1], 1 }
 0x166   :  { %428 = vsyncpa [#allocation5], 1 }
 0x167   :  { %430 = vsyncpa [#allocation5 + $0x1], 1 }
 0x168   :  { %431 = vsyncpa [#allocation10], 1 }
 0x169   :  { %433 = vsyncpa [#allocation10 + $0x1], 1 }

</bundles_post_ra>
